<compile_context>
chip_gen: v6e
topology: v6e:2x2x1
jax: 0.10.0
libtpu: 0.0.40
codegen_flags: <defaults>
</compile_context>

<pallas_src>
import jax
import jax.numpy as jnp
from jax.experimental import pallas as pl
from jax.experimental.pallas import tpu as pltpu


def _round_up(x, m):
    return ((x + m - 1) // m) * m


def _mlp_kernel(x_ref,
                w0_ref, b0_ref,
                w1_ref, b1_ref,
                w2_ref, b2_ref,
                w3_ref, b3_ref,
                w4_ref, b4_ref,
                w5_ref, b5_ref,
                out_ref):
    def linear(h_bf16, w_ref, b_ref):
        # bf16 x bf16 -> f32 accumulate on the MXU, bias add in f32.
        return (jnp.dot(h_bf16, w_ref[...],
                        preferred_element_type=jnp.float32)
                + b_ref[...])

    def relu_bf16(z_f32):
        # ReLU after the downcast (commutes with it) -> bf16 VPU max.
        return jnp.maximum(z_f32.astype(jnp.bfloat16), 0.0)

    # x streamed as f32 straight from HBM; single in-kernel cast to bf16.
    h = relu_bf16(linear(x_ref[...].astype(jnp.bfloat16), w0_ref, b0_ref))
    h = relu_bf16(linear(h, w1_ref, b1_ref))
    h = relu_bf16(linear(h, w2_ref, b2_ref))
    h = relu_bf16(linear(h, w3_ref, b3_ref))
    h = relu_bf16(linear(h, w4_ref, b4_ref))
    z = linear(h, w5_ref, b5_ref)          # fc5: Linear, no ReLU

    # log_softmax along dim=1 (numerically stable, f32).
    m = jnp.max(z, axis=-1, keepdims=True)
    s = z - m
    lse = jnp.log(jnp.sum(jnp.exp(s), axis=-1, keepdims=True))
    out_ref[...] = s - lse


def _choose_tb(B, image_size, vmem_budget_bytes, tb_cap):
    """Batch-tile size from an explicit per-step VMEM budget (all generations)."""
    per_row = (
        2 * image_size * 4            # f32 x tile, double-buffered
        + image_size * 2              # in-kernel bf16 cast of x
        + 2 * 128 * 4                 # out tile (10 -> 128 lane-padded f32), double-buffered
        + 2 * (128 * 4 + 128 * 2)     # fc0/fc1 f32 results + bf16 activations
        + 4 * 128 * 4                 # lane-padded f32 intermediates of the 10-wide tail
    )
    tb = (vmem_budget_bytes // per_row) // 8 * 8
    tb = max(8, min(tb, tb_cap))
    # Aim for >= 2 grid tiles so both v7x TensorCores get work when B allows.
    tb = min(tb, _round_up(-(-B // 2), 8))
    if tb >= B:
        tb = B                        # single tile; block dim == full dim is legal
    return max(tb, 1)


def model_d_forward(x, params, *, vmem_budget_bytes=24 * 1024 * 1024, tb_cap=4096):
    """x: anything whose trailing dims flatten to image_size. Returns (B, 10) f32."""
    image_size = params["w0"].shape[0]
    x2d = x.reshape(-1, image_size)   # stays f32; cast happens inside the kernel
    B = x2d.shape[0]

    TB = _choose_tb(B, image_size, vmem_budget_bytes, tb_cap)
    grid = (pl.cdiv(B, TB),)          # ragged last tile handled by Pallas masking

    # Weights in bf16 for the MXU, biases (1, N) in f32 for the accumulate path.
    flat_params = []
    for i in range(6):
        flat_params.append(params[f"w{i}"].astype(jnp.bfloat16))
        flat_params.append(params[f"b{i}"].astype(jnp.float32))

    def _stream_map(i):               # x / out: step through batch tiles
        return (i, 0)

    def _resident_map(i):             # weights / biases: same block -> stay in VMEM
        return (0, 0)

    in_specs = [pl.BlockSpec((TB, image_size), _stream_map)]
    for arr in flat_params:
        in_specs.append(pl.BlockSpec(arr.shape, _resident_map))

    flops = 2 * B * (image_size * 128 + 128 * 64 + 64 * 10 + 3 * 10 * 10)
    bytes_accessed = (B * image_size * 4 + B * 10 * 4
                      + sum(int(a.size) * a.dtype.itemsize for a in flat_params))

    return pl.pallas_call(
        _mlp_kernel,
        out_shape=jax.ShapeDtypeStruct((B, 10), jnp.float32),
        grid=grid,
        in_specs=in_specs,
        out_specs=pl.BlockSpec((TB, 10), _stream_map),
        compiler_params=pltpu.CompilerParams(
            dimension_semantics=("parallel",),
            vmem_limit_bytes=32 * 1024 * 1024),
        cost_estimate=pl.CostEstimate(
            flops=flops, transcendentals=11 * B, bytes_accessed=bytes_accessed),
    )(x2d, *flat_params)


def init_params(key, image_size):
    """Deterministic parameter init (uniform, roughly PyTorch-Linear-like)."""
    dims = [(image_size, 128), (128, 64), (64, 10), (10, 10), (10, 10), (10, 10)]
    params = {}
    for i, (fan_in, fan_out) in enumerate(dims):
        key, kw, kb = jax.random.split(key, 3)
        bound = 1.0 / jnp.sqrt(float(fan_in))
        params[f"w{i}"] = jax.random.uniform(
            kw, (fan_in, fan_out), jnp.float32, -bound, bound)
        params[f"b{i}"] = jax.random.uniform(
            kb, (1, fan_out), jnp.float32, -bound, bound)
    return params


def _reference_forward(x, params):
    """Pure-JAX reference with the same bf16-matmul / f32-accumulate recipe."""
    image_size = params["w0"].shape[0]
    h = x.reshape(-1, image_size).astype(jnp.bfloat16)
    z = None
    for i in range(6):
        w = params[f"w{i}"].astype(jnp.bfloat16)
        b = params[f"b{i}"].astype(jnp.float32)
        z = jnp.dot(h, w, preferred_element_type=jnp.float32) + b
        if i < 5:
            h = jnp.maximum(z, 0.0).astype(jnp.bfloat16)
    return jax.nn.log_softmax(z, axis=1)


if __name__ == "__main__":
    key = jax.random.PRNGKey(0)
    k_params, k_x1, k_x2 = jax.random.split(key, 3)

    # Small "image" input: 1 channel, 16x16 -> image_size = 256
    image_size = 16 * 16
    params = init_params(k_params, image_size)

    # Case 1: batch = 8 (single tile).
    x1 = jax.random.normal(k_x1, (8, 1, 16, 16), jnp.float32)
    out1 = jax.block_until_ready(model_d_forward(x1, params))
    ref1 = _reference_forward(x1, params)
    assert out1.shape == (8, 10)
    assert jnp.allclose(out1, ref1, atol=2e-3, rtol=2e-3), (
        f"max abs diff {jnp.max(jnp.abs(out1 - ref1))}")

    # Case 2: batch = 20 (two tiles, ragged last tile -> exercises cdiv path).
    x2 = jax.random.normal(k_x2, (20, 1, 16, 16), jnp.float32)
    out2 = jax.block_until_ready(model_d_forward(x2, params))
    ref2 = _reference_forward(x2, params)
    assert out2.shape == (20, 10)
    assert jnp.allclose(out2, ref2, atol=2e-3, rtol=2e-3), (
        f"max abs diff {jnp.max(jnp.abs(out2 - ref2))}")

    print("KERNEL_OK")
</pallas_src>

<mosaic_0001>
module attributes {stable_mosaic.version = 11 : i64} {
  func.func @_mlp_kernel(%arg0: i32, %arg1: memref<8x256xf32, #tpu.memory_space<vmem>>, %arg2: memref<256x128xbf16, #tpu.memory_space<vmem>>, %arg3: memref<1x128xf32, #tpu.memory_space<vmem>>, %arg4: memref<128x64xbf16, #tpu.memory_space<vmem>>, %arg5: memref<1x64xf32, #tpu.memory_space<vmem>>, %arg6: memref<64x10xbf16, #tpu.memory_space<vmem>>, %arg7: memref<1x10xf32, #tpu.memory_space<vmem>>, %arg8: memref<10x10xbf16, #tpu.memory_space<vmem>>, %arg9: memref<1x10xf32, #tpu.memory_space<vmem>>, %arg10: memref<10x10xbf16, #tpu.memory_space<vmem>>, %arg11: memref<1x10xf32, #tpu.memory_space<vmem>>, %arg12: memref<10x10xbf16, #tpu.memory_space<vmem>>, %arg13: memref<1x10xf32, #tpu.memory_space<vmem>>, %arg14: memref<8x10xf32, #tpu.memory_space<vmem>>) attributes {dimension_semantics = [#tpu.dimension_semantics<parallel>], iteration_bounds = array<i64: 1>, scalar_prefetch = 0 : i64, scratch_operands = 0 : i64, tpu.core_type = #tpu.core_type<tc>, window_params = [{transform_indices = @transform_0, window_bounds = array<i64: 8, 256>}, {pipeline_mode = #tpu.pipeline_mode<synchronous>, transform_indices = @transform_1, window_bounds = array<i64: 256, 128>}, {pipeline_mode = #tpu.pipeline_mode<synchronous>, transform_indices = @transform_2, window_bounds = array<i64: 1, 128>}, {pipeline_mode = #tpu.pipeline_mode<synchronous>, transform_indices = @transform_3, window_bounds = array<i64: 128, 64>}, {pipeline_mode = #tpu.pipeline_mode<synchronous>, transform_indices = @transform_4, window_bounds = array<i64: 1, 64>}, {pipeline_mode = #tpu.pipeline_mode<synchronous>, transform_indices = @transform_5, window_bounds = array<i64: 64, 10>}, {pipeline_mode = #tpu.pipeline_mode<synchronous>, transform_indices = @transform_6, window_bounds = array<i64: 1, 10>}, {pipeline_mode = #tpu.pipeline_mode<synchronous>, transform_indices = @transform_7, window_bounds = array<i64: 10, 10>}, {pipeline_mode = #tpu.pipeline_mode<synchronous>, transform_indices = @transform_8, window_bounds = array<i64: 1, 10>}, {pipeline_mode = #tpu.pipeline_mode<synchronous>, transform_indices = @transform_9, window_bounds = array<i64: 10, 10>}, {pipeline_mode = #tpu.pipeline_mode<synchronous>, transform_indices = @transform_10, window_bounds = array<i64: 1, 10>}, {pipeline_mode = #tpu.pipeline_mode<synchronous>, transform_indices = @transform_11, window_bounds = array<i64: 10, 10>}, {pipeline_mode = #tpu.pipeline_mode<synchronous>, transform_indices = @transform_12, window_bounds = array<i64: 1, 10>}, {transform_indices = @transform_13, window_bounds = array<i64: 8, 10>}]} {
    %c0 = arith.constant 0 : index
    %c0_0 = arith.constant 0 : index
    %0 = vector.load %arg1[%c0, %c0_0] : memref<8x256xf32, #tpu.memory_space<vmem>>, vector<8x256xf32>
    %1 = arith.truncf %0 : vector<8x256xf32> to vector<8x256xbf16>
    %c0_1 = arith.constant 0 : index
    %c0_2 = arith.constant 0 : index
    %2 = vector.load %arg2[%c0_1, %c0_2] : memref<256x128xbf16, #tpu.memory_space<vmem>>, vector<256x128xbf16>
    %cst = arith.constant dense<0.000000e+00> : vector<8x128xf32>
    %3 = tpu.matmul %1, %2, %cst {dimension_numbers = #tpu.dot_dimension_numbers<[1], [0], [0], [1], [0, 0, 1, 1], [], []>} : vector<8x256xbf16>, vector<256x128xbf16>, vector<8x128xf32> -> vector<8x128xf32>
    %c0_3 = arith.constant 0 : index
    %c0_4 = arith.constant 0 : index
    %4 = vector.load %arg3[%c0_3, %c0_4] : memref<1x128xf32, #tpu.memory_space<vmem>>, vector<1x128xf32>
    %5 = vector.broadcast %4 : vector<1x128xf32> to vector<8x128xf32>
    %6 = arith.addf %3, %5 : vector<8x128xf32>
    %7 = arith.truncf %6 : vector<8x128xf32> to vector<8x128xbf16>
    %cst_5 = arith.constant 0.000000e+00 : bf16
    %8 = vector.broadcast %cst_5 : bf16 to vector<8x128xbf16>
    %9 = arith.maximumf %7, %8 : vector<8x128xbf16>
    %c0_6 = arith.constant 0 : index
    %c0_7 = arith.constant 0 : index
    %10 = vector.load %arg4[%c0_6, %c0_7] : memref<128x64xbf16, #tpu.memory_space<vmem>>, vector<128x64xbf16>
    %cst_8 = arith.constant dense<0.000000e+00> : vector<8x64xf32>
    %11 = tpu.matmul %9, %10, %cst_8 {dimension_numbers = #tpu.dot_dimension_numbers<[1], [0], [0], [1], [0, 0, 1, 1], [], []>} : vector<8x128xbf16>, vector<128x64xbf16>, vector<8x64xf32> -> vector<8x64xf32>
    %c0_9 = arith.constant 0 : index
    %c0_10 = arith.constant 0 : index
    %12 = vector.load %arg5[%c0_9, %c0_10] : memref<1x64xf32, #tpu.memory_space<vmem>>, vector<1x64xf32>
    %13 = vector.broadcast %12 : vector<1x64xf32> to vector<8x64xf32>
    %14 = arith.addf %11, %13 : vector<8x64xf32>
    %15 = arith.truncf %14 : vector<8x64xf32> to vector<8x64xbf16>
    %cst_11 = arith.constant 0.000000e+00 : bf16
    %16 = vector.broadcast %cst_11 : bf16 to vector<8x64xbf16>
    %17 = arith.maximumf %15, %16 : vector<8x64xbf16>
    %c0_12 = arith.constant 0 : index
    %c0_13 = arith.constant 0 : index
    %18 = vector.load %arg6[%c0_12, %c0_13] : memref<64x10xbf16, #tpu.memory_space<vmem>>, vector<64x10xbf16>
    %cst_14 = arith.constant dense<0.000000e+00> : vector<8x10xf32>
    %19 = tpu.matmul %17, %18, %cst_14 {dimension_numbers = #tpu.dot_dimension_numbers<[1], [0], [0], [1], [0, 0, 1, 1], [], []>} : vector<8x64xbf16>, vector<64x10xbf16>, vector<8x10xf32> -> vector<8x10xf32>
    %c0_15 = arith.constant 0 : index
    %c0_16 = arith.constant 0 : index
    %20 = vector.load %arg7[%c0_15, %c0_16] : memref<1x10xf32, #tpu.memory_space<vmem>>, vector<1x10xf32>
    %21 = vector.broadcast %20 : vector<1x10xf32> to vector<8x10xf32>
    %22 = arith.addf %19, %21 : vector<8x10xf32>
    %23 = arith.truncf %22 : vector<8x10xf32> to vector<8x10xbf16>
    %cst_17 = arith.constant 0.000000e+00 : bf16
    %24 = vector.broadcast %cst_17 : bf16 to vector<8x10xbf16>
    %25 = arith.maximumf %23, %24 : vector<8x10xbf16>
    %c0_18 = arith.constant 0 : index
    %c0_19 = arith.constant 0 : index
    %26 = vector.load %arg8[%c0_18, %c0_19] : memref<10x10xbf16, #tpu.memory_space<vmem>>, vector<10x10xbf16>
    %cst_20 = arith.constant dense<0.000000e+00> : vector<8x10xf32>
    %27 = tpu.matmul %25, %26, %cst_20 {dimension_numbers = #tpu.dot_dimension_numbers<[1], [0], [0], [1], [0, 0, 1, 1], [], []>} : vector<8x10xbf16>, vector<10x10xbf16>, vector<8x10xf32> -> vector<8x10xf32>
    %c0_21 = arith.constant 0 : index
    %c0_22 = arith.constant 0 : index
    %28 = vector.load %arg9[%c0_21, %c0_22] : memref<1x10xf32, #tpu.memory_space<vmem>>, vector<1x10xf32>
    %29 = vector.broadcast %28 : vector<1x10xf32> to vector<8x10xf32>
    %30 = arith.addf %27, %29 : vector<8x10xf32>
    %31 = arith.truncf %30 : vector<8x10xf32> to vector<8x10xbf16>
    %cst_23 = arith.constant 0.000000e+00 : bf16
    %32 = vector.broadcast %cst_23 : bf16 to vector<8x10xbf16>
    %33 = arith.maximumf %31, %32 : vector<8x10xbf16>
    %c0_24 = arith.constant 0 : index
    %c0_25 = arith.constant 0 : index
    %34 = vector.load %arg10[%c0_24, %c0_25] : memref<10x10xbf16, #tpu.memory_space<vmem>>, vector<10x10xbf16>
    %cst_26 = arith.constant dense<0.000000e+00> : vector<8x10xf32>
    %35 = tpu.matmul %33, %34, %cst_26 {dimension_numbers = #tpu.dot_dimension_numbers<[1], [0], [0], [1], [0, 0, 1, 1], [], []>} : vector<8x10xbf16>, vector<10x10xbf16>, vector<8x10xf32> -> vector<8x10xf32>
    %c0_27 = arith.constant 0 : index
    %c0_28 = arith.constant 0 : index
    %36 = vector.load %arg11[%c0_27, %c0_28] : memref<1x10xf32, #tpu.memory_space<vmem>>, vector<1x10xf32>
    %37 = vector.broadcast %36 : vector<1x10xf32> to vector<8x10xf32>
    %38 = arith.addf %35, %37 : vector<8x10xf32>
    %39 = arith.truncf %38 : vector<8x10xf32> to vector<8x10xbf16>
    %cst_29 = arith.constant 0.000000e+00 : bf16
    %40 = vector.broadcast %cst_29 : bf16 to vector<8x10xbf16>
    %41 = arith.maximumf %39, %40 : vector<8x10xbf16>
    %c0_30 = arith.constant 0 : index
    %c0_31 = arith.constant 0 : index
    %42 = vector.load %arg12[%c0_30, %c0_31] : memref<10x10xbf16, #tpu.memory_space<vmem>>, vector<10x10xbf16>
    %cst_32 = arith.constant dense<0.000000e+00> : vector<8x10xf32>
    %43 = tpu.matmul %41, %42, %cst_32 {dimension_numbers = #tpu.dot_dimension_numbers<[1], [0], [0], [1], [0, 0, 1, 1], [], []>} : vector<8x10xbf16>, vector<10x10xbf16>, vector<8x10xf32> -> vector<8x10xf32>
    %c0_33 = arith.constant 0 : index
    %c0_34 = arith.constant 0 : index
    %44 = vector.load %arg13[%c0_33, %c0_34] : memref<1x10xf32, #tpu.memory_space<vmem>>, vector<1x10xf32>
    %45 = vector.broadcast %44 : vector<1x10xf32> to vector<8x10xf32>
    %46 = arith.addf %43, %45 : vector<8x10xf32>
    %cst_35 = arith.constant dense<0xFF800000> : vector<8xf32>
    %47 = vector.multi_reduction <maximumf>, %46, %cst_35 [1] : vector<8x10xf32> to vector<8xf32>
    %48 = vector.shape_cast %47 : vector<8xf32> to vector<8x1xf32>
    %49 = vector.broadcast %48 : vector<8x1xf32> to vector<8x10xf32>
    %50 = arith.subf %46, %49 : vector<8x10xf32>
    %51 = math.exp %50 : vector<8x10xf32>
    %cst_36 = arith.constant dense<0.000000e+00> : vector<8xf32>
    %52 = vector.multi_reduction <add>, %51, %cst_36 [1] : vector<8x10xf32> to vector<8xf32>
    %53 = vector.shape_cast %52 : vector<8xf32> to vector<8x1xf32>
    %54 = math.log %53 : vector<8x1xf32>
    %55 = vector.broadcast %54 : vector<8x1xf32> to vector<8x10xf32>
    %56 = arith.subf %50, %55 : vector<8x10xf32>
    %c0_37 = arith.constant 0 : index
    %c0_38 = arith.constant 0 : index
    %57 = vector.load %arg14[%c0_37, %c0_38] : memref<8x10xf32, #tpu.memory_space<vmem>>, vector<8x10xf32>
    tpu.vector_store %arg14[%c0_37, %c0_38], %56 {strides = array<i32>} : memref<8x10xf32, #tpu.memory_space<vmem>>, vector<8x10xf32>,
    return
  }
  func.func @transform_0(%arg0: i32) -> (i32, i32) {
    %c0_i32 = arith.constant 0 : i32
    %c0_i32_0 = arith.constant 0 : i32
    return %arg0, %c0_i32 : i32, i32
  }
  func.func @transform_1(%arg0: i32) -> (i32, i32) {
    %c0_i32 = arith.constant 0 : i32
    %c0_i32_0 = arith.constant 0 : i32
    %c0_i32_1 = arith.constant 0 : i32
    return %c0_i32, %c0_i32_0 : i32, i32
  }
  func.func @transform_2(%arg0: i32) -> (i32, i32) {
    %c0_i32 = arith.constant 0 : i32
    %c0_i32_0 = arith.constant 0 : i32
    %c0_i32_1 = arith.constant 0 : i32
    return %c0_i32, %c0_i32_0 : i32, i32
  }
  func.func @transform_3(%arg0: i32) -> (i32, i32) {
    %c0_i32 = arith.constant 0 : i32
    %c0_i32_0 = arith.constant 0 : i32
    %c0_i32_1 = arith.constant 0 : i32
    return %c0_i32, %c0_i32_0 : i32, i32
  }
  func.func @transform_4(%arg0: i32) -> (i32, i32) {
    %c0_i32 = arith.constant 0 : i32
    %c0_i32_0 = arith.constant 0 : i32
    %c0_i32_1 = arith.constant 0 : i32
    return %c0_i32, %c0_i32_0 : i32, i32
  }
  func.func @transform_5(%arg0: i32) -> (i32, i32) {
    %c0_i32 = arith.constant 0 : i32
    %c0_i32_0 = arith.constant 0 : i32
    %c0_i32_1 = arith.constant 0 : i32
    return %c0_i32, %c0_i32_0 : i32, i32
  }
  func.func @transform_6(%arg0: i32) -> (i32, i32) {
    %c0_i32 = arith.constant 0 : i32
    %c0_i32_0 = arith.constant 0 : i32
    %c0_i32_1 = arith.constant 0 : i32
    return %c0_i32, %c0_i32_0 : i32, i32
  }
  func.func @transform_7(%arg0: i32) -> (i32, i32) {
    %c0_i32 = arith.constant 0 : i32
    %c0_i32_0 = arith.constant 0 : i32
    %c0_i32_1 = arith.constant 0 : i32
    return %c0_i32, %c0_i32_0 : i32, i32
  }
  func.func @transform_8(%arg0: i32) -> (i32, i32) {
    %c0_i32 = arith.constant 0 : i32
    %c0_i32_0 = arith.constant 0 : i32
    %c0_i32_1 = arith.constant 0 : i32
    return %c0_i32, %c0_i32_0 : i32, i32
  }
  func.func @transform_9(%arg0: i32) -> (i32, i32) {
    %c0_i32 = arith.constant 0 : i32
    %c0_i32_0 = arith.constant 0 : i32
    %c0_i32_1 = arith.constant 0 : i32
    return %c0_i32, %c0_i32_0 : i32, i32
  }
  func.func @transform_10(%arg0: i32) -> (i32, i32) {
    %c0_i32 = arith.constant 0 : i32
    %c0_i32_0 = arith.constant 0 : i32
    %c0_i32_1 = arith.constant 0 : i32
    return %c0_i32, %c0_i32_0 : i32, i32
  }
  func.func @transform_11(%arg0: i32) -> (i32, i32) {
    %c0_i32 = arith.constant 0 : i32
    %c0_i32_0 = arith.constant 0 : i32
    %c0_i32_1 = arith.constant 0 : i32
    return %c0_i32, %c0_i32_0 : i32, i32
  }
  func.func @transform_12(%arg0: i32) -> (i32, i32) {
    %c0_i32 = arith.constant 0 : i32
    %c0_i32_0 = arith.constant 0 : i32
    %c0_i32_1 = arith.constant 0 : i32
    return %c0_i32, %c0_i32_0 : i32, i32
  }
  func.func @transform_13(%arg0: i32) -> (i32, i32) {
    %c0_i32 = arith.constant 0 : i32
    %c0_i32_0 = arith.constant 0 : i32
    return %arg0, %c0_i32 : i32, i32
  }
}

</mosaic_0001>

<bundles_post_ra>
// kernel: tpu_custom_call.1
= control target key start
LH: loop header
LB: loop body
LE: loop exit
PB: predicated region body
PF: predicated region fallthrough
CT: control target
= control target key end

     0   :  { %18 = vsyncpa [#allocation3], 0  ;;  %s1277_s0 = inlined_call_operand.hbm [shape: f32[8,256], index: 0, kind: input, shape index: {}]   ;;  %s1278_s1 = inlined_call_operand.vmem [shape: bf16[256,128], index: 1, kind: input, shape index: {}]   ;;  %s1279_s2 = inlined_call_operand.hbm [shape: f32[1,128], index: 2, kind: input, shape index: {}]   ;;  %s1280_s3 = inlined_call_operand.vmem [shape: bf16[128,64], index: 3, kind: input, shape index: {}]   ;;  %s1281_s4 = inlined_call_operand.hbm [shape: f32[1,64], index: 4, kind: input, shape index: {}]   ;;  %s1282_s5 = inlined_call_operand.vmem [shape: bf16[64,10], index: 5, kind: input, shape index: {}]   ;;  %s1283_s6 = inlined_call_operand.hbm [shape: f32[1,10], index: 6, kind: input, shape index: {}]   ;;  %s1284_s7 = inlined_call_operand.vmem [shape: bf16[10,10], index: 7, kind: input, shape index: {}]   ;;  %s1285_s8 = inlined_call_operand.hbm [shape: f32[1,10], index: 8, kind: input, shape index: {}]   ;;  %s1286_s9 = inlined_call_operand.vmem [shape: bf16[10,10], index: 9, kind: input, shape index: {}]   ;;  %s1287_s10 = inlined_call_operand.vmem [shape: f32[1,10], index: 10, kind: input, shape index: {}]   ;;  %s1288_s11 = inlined_call_operand.hbm [shape: bf16[10,10], index: 11, kind: input, shape index: {}]   ;;  %s1289_s12 = inlined_call_operand.vmem [shape: f32[1,10], index: 12, kind: input, shape index: {}]   ;;  %s1290_s13 = inlined_call_operand.hbm [shape: f32[8,10], index: 13, kind: output, shape index: {}]  }
   0x1   :  { %19 = vsyncpa [#allocation6], 0 }
   0x2   :  { %20 = vsyncpa [#allocation9], 0 }
   0x3   :  { %21 = vsyncpa [#allocation12], 0 }
   0x4   :  { %22 = vsyncpa [#allocation4], 0  ;;  %s1044_s25 = smov [#allocation5]   ;;  %s1045_s27 = smov [#allocation8]  }
   0x5   :  { %s41_s26 = sshll.u32 %s1044_s25, 4  ;;  %s65_s28 = sshll.u32 %s1045_s27, 4  ;;  %s42_s26 = int_to_ptr.vmem [resolvable:$true] %s41_s26  ;;  %s66_s28 = int_to_ptr.vmem [resolvable:$true] %s65_s28 }
   0x6   :  { %s902_s29 = scalar_lea.vmem %s42_s26, 16  ;;  %s906_s30 = scalar_lea.vmem %s42_s26, 32 }
   0x7   :  { %p903_p0 = scmp.ne.s32.totalorder %s42_s26, %s902_s29  ;;  %p907_p1 = scmp.lt.s32.totalorder %s42_s26, %s42_s26 }
   0x8   :  { %p908_p2 = scmp.lt.s32.totalorder %s906_s30, %s902_s29 }
   0xa   :  { %p909_p3 = por %p908_p2, %p907_p1 }
   0xc   :  { %p910_p4 = pnand %p909_p3, %p903_p0 }
   0xe   :  { %913 = shalt.err (!%p910_p4)
}
   0xf   :  { %44 = dma.hbm_to_vmem [thread:$0]  %s1279_s2, 16, %s42_s26, [#allocation6]  }
  0x10   :  { %s922_s16 = scalar_lea.vmem %s66_s28, 16  ;;  %s926_s17 = scalar_lea.vmem %s66_s28, 32 }
  0x11   :  { %p923_p5 = scmp.ne.s32.totalorder %s66_s28, %s922_s16  ;;  %p927_p6 = scmp.lt.s32.totalorder %s66_s28, %s66_s28 }
  0x12   :  { %p928_p7 = scmp.lt.s32.totalorder %s926_s17, %s922_s16 }
  0x14   :  { %p929_p8 = por %p928_p7, %p927_p6 }
  0x16   :  { %p930_p9 = pnand %p929_p8, %p923_p5 }
  0x18   :  { %933 = shalt.err (!%p930_p9)
}
  0x19   :  { %68 = dma.hbm_to_vmem [thread:$0]  %s1283_s6, 16, %s66_s28, [#allocation9]  }
  0x1a   :  { %s1046_s20 = smov [#allocation2]   ;;  %s1047_s22 = smov [#allocation7]  }
  0x1b   :  { %s29_s21 = sshll.u32 %s1046_s20, 4  ;;  %s53_s23 = sshll.u32 %s1047_s22, 4  ;;  %s30_s21 = int_to_ptr.vmem [resolvable:$true] %s29_s21  ;;  %s54_s23 = int_to_ptr.vmem [resolvable:$true] %s53_s23 }
  0x1c   :  { %s942_s24 = scalar_lea.vmem %s30_s21, 256  ;;  %p947_p11 = scmp.lt.s32.totalorder %s30_s21, %s30_s21 }
  0x1d   :  { %p943_p10 = scmp.ne.s32.totalorder %s30_s21, %s942_s24  ;;  %p948_p12 = scmp.lt.s32.totalorder %s942_s24, %s942_s24 }
  0x1f   :  { %p949_p13 = por %p948_p12, %p947_p11 }
  0x21   :  { %p950_p0 = pnand %p949_p13, %p943_p10 }
  0x23   :  { %953 = shalt.err (!%p950_p0)
}
  0x24   :  { %32 = dma.hbm_to_vmem [thread:$0]  %s1277_s0, 256, %s30_s21, [#allocation3]  }
  0x25   :  { %s962_s26 = scalar_lea.vmem %s54_s23, 16  ;;  %s966_s6 = scalar_lea.vmem %s54_s23, 32 }
  0x26   :  { %p963_p1 = scmp.ne.s32.totalorder %s54_s23, %s962_s26  ;;  %p967_p2 = scmp.lt.s32.totalorder %s54_s23, %s54_s23 }
  0x27   :  { %p968_p3 = scmp.lt.s32.totalorder %s966_s6, %s962_s26 }
  0x29   :  { %p969_p4 = por %p968_p3, %p967_p2 }
  0x2b   :  { %p970_p5 = pnand %p969_p4, %p963_p1 }
  0x2d   :  { %973 = shalt.err (!%p970_p5)
}
  0x2e   :  { %56 = dma.hbm_to_vmem [thread:$0]  %s1281_s4, 16, %s54_s23, [#allocation6]  }
  0x2f   :  { %s1048_s29 = smov [#allocation10]   ;;  %s1049_s14 = smov [#allocation11]  }
  0x30   :  { %s77_s30 = sshll.u32 %s1048_s29, 4  ;;  %s90_s15 = sshll.u32 %s1049_s14, 4  ;;  %s78_s30 = int_to_ptr.vmem [resolvable:$true] %s77_s30  ;;  %s91_s15 = int_to_ptr.vmem [resolvable:$true] %s90_s15 }
  0x31   :  { %s982_s16 = scalar_lea.vmem %s78_s30, 16  ;;  %s986_s0 = scalar_lea.vmem %s78_s30, 32 }
  0x32   :  { %p983_p6 = scmp.ne.s32.totalorder %s78_s30, %s982_s16  ;;  %p987_p7 = scmp.lt.s32.totalorder %s78_s30, %s78_s30 }
  0x33   :  { %p988_p8 = scmp.lt.s32.totalorder %s986_s0, %s982_s16 }
  0x35   :  { %p989_p9 = por %p988_p8, %p987_p7 }
  0x37   :  { %p990_p10 = pnand %p989_p9, %p983_p6 }
  0x39   :  { %993 = shalt.err (!%p990_p10)
}
  0x3a   :  { %80 = dma.hbm_to_vmem [thread:$0]  %s1285_s8, 16, %s78_s30, [#allocation9]  }
  0x3b   :  { %s1002_s19 = scalar_lea.vmem %s91_s15, 128  ;;  %p1007_p12 = scmp.lt.s32.totalorder %s91_s15, %s91_s15 }
  0x3c   :  { %p1003_p11 = scmp.ne.s32.totalorder %s91_s15, %s1002_s19  ;;  %p1008_p13 = scmp.lt.s32.totalorder %s1002_s19, %s1002_s19 }
  0x3e   :  { %p1009_p0 = por %p1008_p13, %p1007_p12 }
  0x40   :  { %p1010_p1 = pnand %p1009_p0, %p1003_p11 }
  0x42   :  { %1013 = shalt.err (!%p1010_p1)
}
  0x43   :  { %s1050_s4 = smov 64   ;;  %s1051_s20 = smov 4  }
  0x44   :  { %96 = dma.hbm_to_vmem [thread:$0]  %s1288_s11, 128, %s91_s15, [#allocation12], %s1050_s4, %s1050_s4, %s1051_s20  }
  0x45   :  { %1034 = dma.done.wait [#allocation3], 256  }
  0x46   :  { %1035 = vsyncadd [#allocation3], 4294967040 }
  0x47   :  { %1036 = dma.done.wait [#allocation6], 32  }
  0x48   :  { %1037 = vsyncadd [#allocation6], 4294967264 }
  0x49   :  { %1038 = dma.done.wait [#allocation9], 32  }
  0x4a   :  { %1039 = vsyncadd [#allocation9], 4294967264 }
  0x4b   :  { %1040 = dma.done.wait [#allocation12], 128  }
  0x4c   :  { %1041 = vsyncadd [#allocation12], 4294967168  ;;  %v1052_v0 = vmov 0.0   ;;  %v859_v1 = vld [vmem:[%s1278_s1 + $0x78] sm:$0xff]   ;;  %v861_v3 = vld [vmem:[%s1278_s1 + $0x70] sm:$0xff]   ;;  %vm1053_vm0 = vmmov 0  }
  0x4d   :  { %797 = vmatprep.subr.bf16.mxu1 %v1052_v0  ;;  %v860_v2 = vld [vmem:[%s1278_s1 + $0x38] sm:$0xff]   ;;  %755 = vmatprep.subr.bf16.mxu0 %v859_v1  ;;  %v862_v4 = vld [vmem:[%s1278_s1 + $0x30] sm:$0xff]   ;;  %v863_v5 = vld [vmem:[%s1278_s1 + $0x68] sm:$0xff]   ;;  %v1054_v39 = vmov 0   ;;  %vm515_vm1 = vcmask 1044480   ;;  %vm451_vm2 = vcmask 523264  }
  0x4e   :  { %756 = vmatpush3.bf16.msra.mxu0 %v860_v2  ;;  %v864_v6 = vld [vmem:[%s1278_s1 + $0x28] sm:$0xff]   ;;  %v865_v7 = vld [vmem:[%s1278_s1 + $0x60] sm:$0xff]   ;;  %v867_v9 = vld [vmem:[%s1278_s1 + $0x58] sm:$0xff]   ;;  %813 = vmatprep.mubr.msk.bf16.mxu1 %vm1053_vm0, %v1052_v0  ;;  %vm511_vm3 = vcmask 80896  }
  0x4f   :  { %757 = vmatprep.subr.bf16.mxu0 %v861_v3  ;;  %v866_v8 = vld [vmem:[%s1278_s1 + $0x20] sm:$0xff]   ;;  %v868_v10 = vld [vmem:[%s1278_s1 + $0x18] sm:$0xff]   ;;  %v869_v11 = vld [vmem:[%s1278_s1 + $0x50] sm:$0xff]  }
  0x50   :  { %v119_v12 = vld [vmem:[#allocation2 + $0x8] sm:$0xff]  ;;  %v875_v14 = vld [vmem:[%s1280_s3 + $0x38] sm:$0xff]   ;;  %v870_v15 = vld [vmem:[%s1278_s1 + $0x10] sm:$0xff]  }
  0x51   :  { %v121_v13 = vpack.c.bf16 %v119_v12, %v119_v12  ;;  %v871_v16 = vld [vmem:[%s1278_s1 + $0x48] sm:$0xff]   ;;  %798 = vmatpush3.bf16.msra.mxu1 %v875_v14  ;;  %v876_v17 = vld [vmem:[%s1280_s3 + $0x30] sm:$0xff]   ;;  %v873_v19 = vld [vmem:[%s1278_s1 + $0x40] sm:$0xff]  }
  0x52   :  { %758 = vmatpush3.bf16.msra.mxu0 %v862_v4  ;;  %v872_v18 = vld [vmem:[%s1278_s1 + $0x8] sm:$0xff]   ;;  %799 = vmatprep.subr.bf16.mxu1 %v1052_v0  ;;  %v874_v21 = vld [vmem:[%s1278_s1] sm:$0xff]   ;;  %v879_v25 = vld [vmem:[%s1280_s3 + $0x18] sm:$0xff]  }
  0x53   :  { %759 = vmatprep.subr.bf16.mxu0 %v863_v5  ;;  %289 = vmatprep.mubr.bf16.mxu0 %v121_v13  ;;  %v877_v20 = vld [vmem:[%s1280_s3 + $0x28] sm:$0xff]   ;;  %v118_v22 = vld [vmem:[#allocation2] sm:$0xff]  ;;  %v880_v26 = vld [vmem:[%s1280_s3 + $0x10] sm:$0xff]  }
  0x54   :  { %v878_v23 = vld [vmem:[%s1280_s3 + $0x20] sm:$0xff]   ;;  %v120_v24 = vpack.c.bf16 %v118_v22, %v118_v22  ;;  %v881_v27 = vld [vmem:[%s1280_s3 + $0x8] sm:$0xff]   ;;  %v883_v29 = vld [vmem:[%s1282_s5 + $0x18] sm:$0xff]  }
  0x55   :  { %800 = vmatpush3.bf16.msra.mxu1 %v876_v17  ;;  %v882_v28 = vld [vmem:[%s1280_s3] sm:$0xff]   ;;  %v884_v30 = vld [vmem:[%s1282_s5 + $0x10] sm:$0xff]   ;;  %v885_v41 = vld [vmem:[%s1282_s5 + $0x8] sm:$0xff]  }
  0x56   :  { %760 = vmatpush3.bf16.msra.mxu0 %v864_v6  ;;  %801 = vmatprep.subr.bf16.mxu1 %v1052_v0  ;;  %v714_v32 = vld [vmem:[#allocation5] ss:$0 sm:$0xff]  ;;  %v886_v42 = vld [vmem:[%s1282_s5] sm:$0xff]   ;;  %v731_v45 = vld [vmem:[#allocation7] ss:$0 sm:$0xff] }
  0x57   :  { %761 = vmatprep.subr.bf16.mxu0 %v865_v7  ;;  %v887_v43 = vld [vmem:[%s1284_s7] sm:$0x1f]   ;;  %v740_v53 = vld [vmem:[#allocation8] ss:$0 sm:$0xff]  ;;  %v889_v63 = vld [vmem:[#allocation11] sm:$0x1f]  }
  0x58   :  { %v517_v44 = vsel %vm515_vm1, %v887_v43, 0  ;;  %v888_v56 = vld [vmem:[%s1286_s9] sm:$0x1f]   ;;  %v641_v1 = vsel %vm515_vm1, %v889_v63, 0  ;;  %v746_v2 = vld [vmem:[#allocation10] ss:$0 sm:$0xff] }
  0x59   :  { %802 = vmatpush3.bf16.msra.mxu1 %v877_v20  ;;  %v579_v61 = vsel %vm515_vm1, %v888_v56, 0  ;;  %v752_v17 = vld [vmem:[%s1289_s12] ss:$0 sm:$0xff] }
  0x5a   :  { %762 = vmatpush3.bf16.msra.mxu0 %v866_v8  ;;  %803 = vmatprep.subr.bf16.mxu1 %v1052_v0 }
  0x5b   :  { %763 = vmatprep.subr.bf16.mxu0 %v867_v9 }
  0x5d   :  { %804 = vmatpush3.bf16.msra.mxu1 %v878_v23 }
  0x5e   :  { %764 = vmatpush3.bf16.msra.mxu0 %v868_v10  ;;  %805 = vmatprep.subr.bf16.mxu1 %v1052_v0  ;;  %v749_v10 = vld [vmem:[%s1287_s10] ss:$0 sm:$0xff]  ;;  %s1055_s10 = smov [#allocation13]  }
  0x5f   :  { %765 = vmatprep.subr.bf16.mxu0 %v869_v11  ;;  %s702_s12 = sshll.u32 %s1055_s10, 4  ;;  %s703_s12 = int_to_ptr.vmem [resolvable:$true] %s702_s12 }
  0x60   :  { %s1014_s15 = scalar_lea.vmem %s703_s12, 128  ;;  %p1019_p3 = scmp.lt.s32.totalorder %s703_s12, %s703_s12 }
  0x61   :  { %806 = vmatpush3.bf16.msra.mxu1 %v879_v25  ;;  %p1015_p2 = scmp.ne.s32.totalorder %s703_s12, %s1014_s15  ;;  %p1020_p4 = scmp.lt.s32.totalorder %s1014_s15, %s1014_s15 }
  0x62   :  { %766 = vmatpush3.bf16.msra.mxu0 %v870_v15  ;;  %807 = vmatprep.subr.bf16.mxu1 %v1052_v0 }
  0x63   :  { %767 = vmatprep.subr.bf16.mxu0 %v871_v16  ;;  %p1021_p5 = por %p1020_p4, %p1019_p3 }
  0x65   :  { %808 = vmatpush3.bf16.msra.mxu1 %v880_v26  ;;  %p1022_p6 = pnand %p1021_p5, %p1015_p2 }
  0x66   :  { %768 = vmatpush3.bf16.msra.mxu0 %v872_v18  ;;  %809 = vmatprep.subr.bf16.mxu1 %v1052_v0 }
  0x67   :  { %769 = vmatprep.subr.bf16.mxu0 %v873_v19 }
  0x69   :  { %810 = vmatpush3.bf16.msra.mxu1 %v881_v27 }
  0x6a   :  { %770 = vmatpush3.bf16.msra.mxu0 %v874_v21  ;;  %811 = vmatprep.subr.bf16.mxu1 %v1052_v0 }
  0x6b   :  { %817 = vmatprep.subr.bf16.mxu0 %v1052_v0 }
  0x6d   :  { %290 = vmatmul.mubr.bf16.vlgmr.msra.gmra.mxu0 %v120_v24  ;;  %812 = vmatpush3.bf16.msra.mxu1 %v882_v28 }
  0x6e   :  { %825 = vmatprep.mubr.msk.bf16.mxu0 %vm1053_vm0, %v1052_v0  ;;  %829 = vmatprep.subr.bf16.mxu1 %v1052_v0 }
  0x6f   :  { %818 = vmatpush3.bf16.msra.mxu0 %v883_v29 }
  0x70   :  { %819 = vmatprep.subr.bf16.mxu0 %v1052_v0 }
  0x73   :  { %820 = vmatpush3.bf16.msra.mxu0 %v884_v30 }
  0x74   :  { %821 = vmatprep.subr.bf16.mxu0 %v1052_v0 }
  0x77   :  { %822 = vmatpush3.bf16.msra.mxu0 %v885_v41 }
  0x78   :  { %823 = vmatprep.subr.bf16.mxu0 %v1052_v0 }
  0x7b   :  { %824 = vmatpush3.bf16.msra.mxu0 %v886_v42 }
  0x7c   :  { %841 = vmatprep.subr.bf16.mxu0 %v1052_v0 }
 0x12d   :  { %v771_v31 = vpop.f32.mrf.mxu0 }
 0x12f   :  { %v772_v33 = vpop.f32.mrf.mxu0 }
 0x130   :  { %v773_v34 = vadd.f32 %v772_v33, %v771_v31 }
 0x131   :  { %v774_v35 = vpop.f32.mrf.mxu0 }
 0x132   :  { %v292_v36 = vadd.f32 %v773_v34, %v714_v32 }
 0x133   :  { %v775_v37 = vpop.f32.mrf.mxu0 }
 0x134   :  { %v297_v38 = vpack.c.bf16 %v292_v36, %v292_v36 }
 0x136   :  { %v298_v40 = vmax.bf16 %v1054_v39, %v297_v38 }
 0x138   :  { %814 = vmatmul.mubr.bf16.vlgmr.msra.gmra.mxu1 %v298_v40 }
 0x139   :  { %831 = vmatprep.mubr.msk.bf16.mxu1 %vm1053_vm0, %v1052_v0  ;;  %830 = vmatpush3.bf16.msra.mxu1 %v517_v44 }
 0x13a   :  { %835 = vmatprep.subr.bf16.mxu1 %v1052_v0 }
 0x1f8   :  { %v404_v46 = vpop.f32.mrf.mxu1 }
 0x1f9   :  { %v405_v47 = vadd.f32 %v731_v45, %v404_v46 }
 0x1fa   :  { %v815_v48 = vpop.f32.mrf.mxu1 }
 0x1fb   :  { %v410_v49 = vpack.c.bf16 %v405_v47, %v405_v47 }
 0x1fc   :  { %v407_v50 = vpop.f32.mrf.mxu1 }
 0x1fd   :  { %v411_v51 = vmax.bf16 %v1054_v39, %v410_v49 }
 0x1fe   :  { %v816_v52 = vpop.f32.mrf.mxu1 }
 0x1ff   :  { %826 = vmatmul.mubr.msk.bf16.vlgmr.msra.gmra.mxu0 %vm451_vm2, %v411_v51 }
 0x200   :  { %843 = vmatprep.mubr.msk.bf16.mxu0 %vm1053_vm0, %v1052_v0  ;;  %842 = vmatpush3.bf16.msra.mxu0 %v641_v1 }
 0x2bf   :  { %v489_v54 = vpop.f32.mrf.mxu0 }
 0x2c0   :  { %v490_v55 = vadd.f32 %v740_v53, %v489_v54 }
 0x2c1   :  { %v827_v57 = vpop.f32.mrf.mxu0 }
 0x2c2   :  { %v495_v58 = vpack.c.bf16 %v490_v55, %v490_v55 }
 0x2c3   :  { %v492_v59 = vpop.f32.mrf.mxu0 }
 0x2c4   :  { %v496_v60 = vmax.bf16 %v1054_v39, %v495_v58 }
 0x2c5   :  { %v828_v62 = vpop.f32.mrf.mxu0 }
 0x2c6   :  { %832 = vmatmul.mubr.msk.bf16.vlgmr.msra.gmra.mxu1 %vm511_vm3, %v496_v60 }
 0x2c7   :  { %836 = vmatpush3.bf16.msra.mxu1 %v579_v61  ;;  %837 = vmatprep.mubr.msk.bf16.mxu1 %vm1053_vm0, %v1052_v0 }
 0x386   :  { %v553_v3 = vpop.f32.mrf.mxu1 }
 0x387   :  { %v554_v4 = vadd.f32 %v746_v2, %v553_v3 }
 0x388   :  { %v833_v5 = vpop.f32.mrf.mxu1 }
 0x389   :  { %v559_v6 = vpack.c.bf16 %v554_v4, %v554_v4 }
 0x38a   :  { %v556_v7 = vpop.f32.mrf.mxu1 }
 0x38b   :  { %v560_v8 = vmax.bf16 %v1054_v39, %v559_v6 }
 0x38c   :  { %v834_v9 = vpop.f32.mrf.mxu1 }
 0x38d   :  { %838 = vmatmul.mubr.msk.bf16.vlgmr.msra.gmra.mxu1 %vm511_vm3, %v560_v8 }
 0x44d   :  { %v615_v11 = vpop.f32.mrf.mxu1 }
 0x44e   :  { %v616_v0 = vadd.f32 %v749_v10, %v615_v11 }
 0x44f   :  { %v839_v12 = vpop.f32.mrf.mxu1 }
 0x450   :  { %v621_v13 = vpack.c.bf16 %v616_v0, %v616_v0 }
 0x451   :  { %v618_v14 = vpop.f32.mrf.mxu1 }
 0x452   :  { %v622_v15 = vmax.bf16 %v1054_v39, %v621_v13 }
 0x453   :  { %v840_v16 = vpop.f32.mrf.mxu1 }
 0x454   :  { %844 = vmatmul.mubr.msk.bf16.vlgmr.msra.gmra.mxu0 %vm511_vm3, %v622_v15 }
 0x514   :  { %v677_v18 = vpop.f32.mrf.mxu0 }
 0x515   :  { %v678_v19 = vadd.f32 %v752_v17, %v677_v18 }
 0x516   :  { %v845_v20 = vpop.f32.mrf.mxu0 }
 0x517   :  { %v683_v21 = vsel %vm511_vm3, %v678_v19, -inf }
 0x518   :  { %684 = vmax.xlane.f32.xlu0 %v683_v21  ;;  %v680_v22 = vpop.f32.mrf.mxu0 }
 0x51a   :  { %v846_v23 = vpop.f32.mrf.mxu0 }
 0x5a1   :  { %v685_v24 = vpop.xlane.xlu0 %684 }
 0x5a2   :  { %v686_v25 = vsub.f32 %v678_v19, %v685_v24 }
 0x5a4   :  { %v687_v26 = vmul.f32 1.442695, %v686_v25 }
 0x5a6   :  { %890 = vpow2.f32 %v687_v26 }
 0x5b3   :  { %v891_v27 = vpop.eup %890 }
 0x5b4   :  { %v689_v28 = vsel %vm511_vm3, %v891_v27, 0.0 }
 0x5b5   :  { %690 = vadd.xlane.f32.xlu0 %v689_v28 }
 0x63e   :  { %v691_v29 = vpop.xlane.xlu0 %690 }
 0x63f   :  { %892 = vlog2.f32 %v691_v29 }
 0x64c   :  { %v893_v30 = vpop.eup %892 }
 0x64d   :  { %v693_v31 = vmul.f32 0.6931472, %v893_v30 }
 0x64f   :  { %v694_v32 = vsub.f32 %v686_v25, %v693_v31 }
 0x651   :  { %695 = vst.msk [vmem:[#allocation13] sm:$0xff] %vm511_vm3, %v694_v32 }
 0x652   :  { %1025 = shalt.err (!%p1022_p6)
}
 0x653   :  { %705 = dma.vmem_to_hbm [thread:$0]  %s703_s12, 128, %s1290_s13, [#allocation4]  }
 0x654   :  { %1042 = dma.done.wait [#allocation4], 128  }
 0x655   :  { %1043 = vsyncadd [#allocation4], 4294967168 }
 0x656   :  { %709 = vsyncpa [#allocation3], 1 }
 0x657   :  { %710 = vsyncpa [#allocation6], 1 }
 0x658   :  { %711 = vsyncpa [#allocation9], 1 }
 0x659   :  { %712 = vsyncpa [#allocation12], 1 }
 0x65a   :  { %713 = vsyncpa [#allocation4], 1 }

</bundles_post_ra>
